<compile_context>
chip_gen: v7x
topology: tpu7x:2x2x1
jax: 0.10.0
libtpu: 0.0.40
codegen_flags: <defaults>
</compile_context>

<pallas_src>
import functools
import math

import jax
import jax.numpy as jnp
from jax.experimental import pallas as pl
from jax.experimental.pallas import tpu as pltpu


_VMEM_LIMIT_BYTES = 48 * 1024 * 1024  # fits v7x's 64 MiB, above v5e/v6e defaults


def _round_up(x, m):
    return (x + m - 1) // m * m


# ---------------------------------------------------------------------------
# Pass 1: projection  h = x @ W ,  e2 = h @ [a1 | a2]
# ---------------------------------------------------------------------------
def _proj_kernel(x_ref, w_ref, a12_ref, h_ref, e2_ref):
    h = jnp.dot(x_ref[...], w_ref[...], preferred_element_type=jnp.float32)
    e2_ref[...] = jnp.dot(h, a12_ref[...], preferred_element_type=jnp.float32)
    h_ref[...] = h.astype(h_ref.dtype)


# ---------------------------------------------------------------------------
# Pass 2: masked attention with online softmax + attn @ h
# ---------------------------------------------------------------------------
def _attn_kernel(e_src_ref, e_dst_ref, adj_ref, h_ref, out_ref,
                 m_sc, l_sc, acc_sc, *, alpha, concat):
    j = pl.program_id(1)

    @pl.when(j == 0)
    def _():
        m_sc[...] = jnp.full(m_sc.shape, -jnp.inf, m_sc.dtype)
        l_sc[...] = jnp.zeros(l_sc.shape, l_sc.dtype)
        acc_sc[...] = jnp.zeros(acc_sc.shape, acc_sc.dtype)

    # e_ij = leakyrelu(e_src_i + e_dst_j)  for this (row, col) tile
    e = e_src_ref[...] + e_dst_ref[...]                 # (TR,1)+(1,TC) -> (TR,TC)
    e = jnp.where(e > 0, e, alpha * e)                  # LeakyReLU (f32, VPU)
    masked = jnp.where(adj_ref[...] > 0, e, jnp.float32(-9e15))

    # online softmax update
    m_prev = m_sc[...]
    m_new = jnp.maximum(m_prev, jnp.max(masked, axis=1, keepdims=True))
    corr = jnp.exp(m_prev - m_new)
    p = jnp.exp(masked - m_new)                         # (TR, TC) f32

    l_sc[...] = corr * l_sc[...] + jnp.sum(p, axis=1, keepdims=True)
    acc_sc[...] = corr * acc_sc[...] + jnp.dot(
        p.astype(jnp.bfloat16), h_ref[...], preferred_element_type=jnp.float32)
    m_sc[...] = m_new

    @pl.when(j == pl.num_programs(1) - 1)
    def _():
        hp = acc_sc[...] * pl.reciprocal(l_sc[...], approx=True)
        if concat:
            # ELU(alpha=1); clamp arg so exp never overflows on the dead branch
            hp = jnp.where(hp > 0, hp, jnp.exp(jnp.minimum(hp, 0.0)) - 1.0)
        out_ref[...] = hp.astype(out_ref.dtype)


# ---------------------------------------------------------------------------
# Wrapper
# ---------------------------------------------------------------------------
def gat_forward(x, adj, W, a, *, alpha, concat=True):
    """GAT layer forward.  x: (N, F_in), adj: (N, N), W: (F_in, F_out), a: (2*F_out, 1)."""
    n, f_in = x.shape
    f_out = W.shape[1]

    f_in_p = _round_up(f_in, 128)
    f_out_p = _round_up(f_out, 128)

    n_p = _round_up(n, 128)
    if n_p >= 512:
        n_p = _round_up(n_p, 512)
        tr, tc = 256, 512            # row tile (parallel) / col tile (reduction)
    else:
        tr = tc = n_p                # small graphs: single tile

    # --- pad inputs to hardware-friendly shapes ----------------------------
    x_p = jnp.zeros((n_p, f_in_p), jnp.float32).at[:n, :f_in].set(
        x.astype(jnp.float32))
    w_p = jnp.zeros((f_in_p, f_out_p), jnp.float32).at[:f_in, :f_out].set(
        W.astype(jnp.float32))
    a12 = jnp.concatenate([a[:f_out, :], a[f_out:, :]], axis=1)        # (F_out, 2)
    a12_p = jnp.zeros((f_out_p, 128), jnp.float32).at[:f_out, :2].set(
        a12.astype(jnp.float32))
    adj_i8 = jnp.zeros((n_p, n_p), jnp.int8).at[:n, :n].set(
        (adj > 0).astype(jnp.int8))

    # --- pass 1: projection -------------------------------------------------
    h_bf, e2 = pl.pallas_call(
        _proj_kernel,
        out_shape=(jax.ShapeDtypeStruct((n_p, f_out_p), jnp.bfloat16),
                   jax.ShapeDtypeStruct((n_p, 128), jnp.float32)),
        grid=(n_p // tr,),
        in_specs=[pl.BlockSpec((tr, f_in_p), lambda i: (i, 0)),
                  pl.BlockSpec((f_in_p, f_out_p), lambda i: (0, 0)),
                  pl.BlockSpec((f_out_p, 128), lambda i: (0, 0))],
        out_specs=(pl.BlockSpec((tr, f_out_p), lambda i: (i, 0)),
                   pl.BlockSpec((tr, 128), lambda i: (i, 0))),
        compiler_params=pltpu.CompilerParams(
            dimension_semantics=("parallel",),
            vmem_limit_bytes=_VMEM_LIMIT_BYTES),
    )(x_p, w_p, a12_p)

    e_src = e2[:, 0:1]                         # (N_p, 1)  source logits
    e_dst_row = e2[:, 1:2].T                   # (1, N_p)  lane-dense target logits

    # --- pass 2: masked softmax attention + attn @ h ------------------------
    kernel = functools.partial(_attn_kernel, alpha=float(alpha),
                               concat=bool(concat))
    out_p = pl.pallas_call(
        kernel,
        out_shape=jax.ShapeDtypeStruct((n_p, f_out_p), jnp.float32),
        grid_spec=pltpu.PrefetchScalarGridSpec(
            num_scalar_prefetch=0,
            grid=(n_p // tr, n_p // tc),
            in_specs=[pl.BlockSpec((tr, 1), lambda i, j: (i, 0)),       # e_src
                      pl.BlockSpec((1, tc), lambda i, j: (0, j)),       # e_dst
                      pl.BlockSpec((tr, tc), lambda i, j: (i, j)),      # adj int8
                      pl.BlockSpec((tc, f_out_p), lambda i, j: (j, 0))],# h bf16
            out_specs=pl.BlockSpec((tr, f_out_p), lambda i, j: (i, 0)),
            scratch_shapes=[pltpu.VMEM((tr, 1), jnp.float32),           # m
                            pltpu.VMEM((tr, 1), jnp.float32),           # l
                            pltpu.VMEM((tr, f_out_p), jnp.float32)]),   # acc
        compiler_params=pltpu.CompilerParams(
            dimension_semantics=("parallel", "arbitrary"),
            vmem_limit_bytes=_VMEM_LIMIT_BYTES),
    )(e_src, e_dst_row, adj_i8, h_bf)

    return out_p[:n, :f_out]


# ---------------------------------------------------------------------------
# Reference + test harness
# ---------------------------------------------------------------------------
def _xavier_uniform(key, shape, gain):
    fan_in, fan_out = shape[0], shape[1]
    bound = gain * math.sqrt(6.0 / (fan_in + fan_out))
    return jax.random.uniform(key, shape, jnp.float32, minval=-bound, maxval=bound)


def _reference(x, adj, W, a, alpha, concat):
    # Pure-JAX f32 reference mirroring the PyTorch forward (eval mode).
    h = x @ W
    n, f_out = h.shape
    a_input = jnp.concatenate(
        [jnp.repeat(h, n, axis=0), jnp.tile(h, (n, 1))], axis=1
    ).reshape(n, n, 2 * f_out)
    e = (a_input @ a)[..., 0]
    e = jnp.where(e > 0, e, alpha * e)
    attn = jnp.where(adj > 0, e, jnp.float32(-9e15))
    attn = jax.nn.softmax(attn, axis=1)
    hp = attn @ h
    return jax.nn.elu(hp) if concat else hp


def _run_case(seed, n, f_in, f_out, alpha, concat):
    key = jax.random.PRNGKey(seed)
    kx, kadj, kw, ka = jax.random.split(key, 4)

    x = jax.random.normal(kx, (n, f_in), jnp.float32)
    adj = (jax.random.uniform(kadj, (n, n)) > 0.6).astype(jnp.float32)
    adj = jnp.maximum(adj, jnp.eye(n, dtype=jnp.float32))   # self-loops

    W = _xavier_uniform(kw, (f_in, f_out), gain=1.414)
    a = _xavier_uniform(ka, (2 * f_out, 1), gain=1.414)

    out = gat_forward(x, adj, W, a, alpha=alpha, concat=concat)
    out = jax.block_until_ready(out)

    ref = _reference(x, adj, W, a, alpha, concat)
    assert out.shape == (n, f_out)
    # bf16 MXU operands (f32 accumulation) + approx reciprocal -> ~0.5% error
    assert jnp.allclose(out, ref, atol=3e-2, rtol=3e-2), \
        f"mismatch vs reference (n={n}, max err {jnp.max(jnp.abs(out - ref))})"


if __name__ == "__main__":
    ALPHA = 0.2   # LeakyReLU negative slope
    # Small case (single tile path): 16 nodes, 8 -> 32 features, concat=True.
    _run_case(seed=0, n=16, f_in=8, f_out=32, alpha=ALPHA, concat=True)
    # Larger case exercising the tiled online-softmax path
    # (N padded to 1024, grid = 4 row blocks x 2 col blocks), concat=False.
    _run_case(seed=1, n=640, f_in=48, f_out=64, alpha=ALPHA, concat=False)

    print("KERNEL_OK")
</pallas_src>

<mosaic_0001>
module attributes {stable_mosaic.version = 11 : i64} {
  func.func @_proj_kernel(%arg0: i32, %arg1: memref<128x128xf32, #tpu.memory_space<vmem>>, %arg2: memref<128x128xf32, #tpu.memory_space<vmem>>, %arg3: memref<128x128xf32, #tpu.memory_space<vmem>>, %arg4: memref<128x128xbf16, #tpu.memory_space<vmem>>, %arg5: memref<128x128xf32, #tpu.memory_space<vmem>>) attributes {dimension_semantics = [#tpu.dimension_semantics<parallel>], iteration_bounds = array<i64: 1>, scalar_prefetch = 0 : i64, scratch_operands = 0 : i64, tpu.core_type = #tpu.core_type<tc>, window_params = [{transform_indices = @transform_0, window_bounds = array<i64: 128, 128>}, {pipeline_mode = #tpu.pipeline_mode<synchronous>, transform_indices = @transform_1, window_bounds = array<i64: 128, 128>}, {pipeline_mode = #tpu.pipeline_mode<synchronous>, transform_indices = @transform_2, window_bounds = array<i64: 128, 128>}, {transform_indices = @transform_3, window_bounds = array<i64: 128, 128>}, {transform_indices = @transform_4, window_bounds = array<i64: 128, 128>}]} {
    %c0 = arith.constant 0 : index
    %c0_0 = arith.constant 0 : index
    %0 = vector.load %arg1[%c0, %c0_0] : memref<128x128xf32, #tpu.memory_space<vmem>>, vector<128x128xf32>
    %c0_1 = arith.constant 0 : index
    %c0_2 = arith.constant 0 : index
    %1 = vector.load %arg2[%c0_1, %c0_2] : memref<128x128xf32, #tpu.memory_space<vmem>>, vector<128x128xf32>
    %cst = arith.constant dense<0.000000e+00> : vector<128x128xf32>
    %2 = tpu.matmul %0, %1, %cst {dimension_numbers = #tpu.dot_dimension_numbers<[1], [0], [0], [1], [0, 0, 1, 1], [], []>} : vector<128x128xf32>, vector<128x128xf32>, vector<128x128xf32> -> vector<128x128xf32>
    %c0_3 = arith.constant 0 : index
    %c0_4 = arith.constant 0 : index
    %3 = vector.load %arg3[%c0_3, %c0_4] : memref<128x128xf32, #tpu.memory_space<vmem>>, vector<128x128xf32>
    %cst_5 = arith.constant dense<0.000000e+00> : vector<128x128xf32>
    %4 = tpu.matmul %2, %3, %cst_5 {dimension_numbers = #tpu.dot_dimension_numbers<[1], [0], [0], [1], [0, 0, 1, 1], [], []>} : vector<128x128xf32>, vector<128x128xf32>, vector<128x128xf32> -> vector<128x128xf32>
    %c0_6 = arith.constant 0 : index
    %c0_7 = arith.constant 0 : index
    %5 = vector.load %arg5[%c0_6, %c0_7] : memref<128x128xf32, #tpu.memory_space<vmem>>, vector<128x128xf32>
    tpu.vector_store %arg5[%c0_6, %c0_7], %4 {strides = array<i32>} : memref<128x128xf32, #tpu.memory_space<vmem>>, vector<128x128xf32>,
    %6 = arith.truncf %2 : vector<128x128xf32> to vector<128x128xbf16>
    %c0_8 = arith.constant 0 : index
    %c0_9 = arith.constant 0 : index
    %7 = vector.load %arg4[%c0_8, %c0_9] : memref<128x128xbf16, #tpu.memory_space<vmem>>, vector<128x128xbf16>
    tpu.vector_store %arg4[%c0_8, %c0_9], %6 {strides = array<i32>} : memref<128x128xbf16, #tpu.memory_space<vmem>>, vector<128x128xbf16>,
    return
  }
  func.func @transform_0(%arg0: i32) -> (i32, i32) {
    %c0_i32 = arith.constant 0 : i32
    %c0_i32_0 = arith.constant 0 : i32
    return %arg0, %c0_i32 : i32, i32
  }
  func.func @transform_1(%arg0: i32) -> (i32, i32) {
    %c0_i32 = arith.constant 0 : i32
    %c0_i32_0 = arith.constant 0 : i32
    %c0_i32_1 = arith.constant 0 : i32
    return %c0_i32, %c0_i32_0 : i32, i32
  }
  func.func @transform_2(%arg0: i32) -> (i32, i32) {
    %c0_i32 = arith.constant 0 : i32
    %c0_i32_0 = arith.constant 0 : i32
    %c0_i32_1 = arith.constant 0 : i32
    return %c0_i32, %c0_i32_0 : i32, i32
  }
  func.func @transform_3(%arg0: i32) -> (i32, i32) {
    %c0_i32 = arith.constant 0 : i32
    %c0_i32_0 = arith.constant 0 : i32
    return %arg0, %c0_i32 : i32, i32
  }
  func.func @transform_4(%arg0: i32) -> (i32, i32) {
    %c0_i32 = arith.constant 0 : i32
    %c0_i32_0 = arith.constant 0 : i32
    return %arg0, %c0_i32 : i32, i32
  }
}

</mosaic_0001>

<bundles_post_ra>
// kernel: tpu_custom_call.1
= control target key start
LH: loop header
LB: loop body
LE: loop exit
PB: predicated region body
PF: predicated region fallthrough
CT: control target
= control target key end

     0   :  { %10 = vsyncpa [#allocation3], 0  ;;  %s1086_s0 = inlined_call_operand.hbm [shape: f32[128,128], index: 0, kind: input, shape index: {}]   ;;  %s1087_s1 = inlined_call_operand.hbm [shape: f32[128,128], index: 1, kind: input, shape index: {}]   ;;  %s1088_s2 = inlined_call_operand.hbm [shape: f32[128,128], index: 2, kind: input, shape index: {}]   ;;  %s1089_s3 = inlined_call_operand.hbm [shape: bf16[128,128], index: 3, kind: output, shape index: {0}]   ;;  %s1090_s4 = inlined_call_operand.hbm [shape: f32[128,128], index: 4, kind: output, shape index: {1}]  }
   0x1   :  { %11 = vsyncpa [#allocation6], 0 }
   0x2   :  { %12 = vsyncpa [#allocation4], 0 }
   0x3   :  { %13 = vsyncpa [#allocation10], 0  ;;  %s973_s15 = smov [#allocation5]   ;;  %s974_s17 = smov [#allocation2]  }
   0x4   :  { %s31_s16 = sshll.u32 %s973_s15, 4  ;;  %s19_s18 = sshll.u32 %s974_s17, 4  ;;  %s32_s16 = int_to_ptr.vmem [resolvable:$true] %s31_s16  ;;  %s1007_s18 = int_to_ptr.vmem [resolvable:$true] %s19_s18 }
   0x5   :  { %s855_s21 = scalar_lea.hbm %s1087_s1, 2048 }
   0x6   :  { %p856_p0 = scmp.ne.s32.totalorder %s1087_s1, %s855_s21  ;;  %p859_p1 = scmp.lt.u32.totalorder %s855_s21, %s1087_s1 }
   0x8   :  { %p861_p2 = pnand %p859_p1, %p856_p0 }
   0xa   :  { %864 = shalt.err (!%p861_p2)
}
   0xb   :  { %s865_s26 = scalar_lea.vmem %s32_s16, 2048  ;;  %p870_p4 = scmp.lt.s32.totalorder %s32_s16, %s32_s16 }
   0xc   :  { %p866_p3 = scmp.ne.s32.totalorder %s32_s16, %s865_s26  ;;  %p871_p5 = scmp.lt.s32.totalorder %s865_s26, %s865_s26 }
   0xe   :  { %p872_p6 = por %p871_p5, %p870_p4 }
  0x10   :  { %p873_p7 = pnand %p872_p6, %p866_p3 }
  0x12   :  { %876 = shalt.err (!%p873_p7)
}
  0x13   :  { %s975_s27 = smov 128   ;;  %s976_s28 = smov 8  }
  0x14   :  { %37 = dma.hbm_to_vmem [thread:$0]  %s1087_s1, 2048, %s32_s16, [#allocation6], %s975_s27, %s975_s27, %s976_s28  }
  0x15   :  { %s877_s7 = scalar_lea.hbm %s1086_s0, 2048 }
  0x16   :  { %p878_p8 = scmp.ne.s32.totalorder %s1086_s0, %s877_s7  ;;  %p881_p9 = scmp.lt.u32.totalorder %s877_s7, %s1086_s0 }
  0x18   :  { %p883_p10 = pnand %p881_p9, %p878_p8 }
  0x1a   :  { %886 = shalt.err (!%p883_p10)
}
  0x1b   :  { %s887_s12 = scalar_lea.vmem %s1007_s18, 2048  ;;  %p892_p12 = scmp.lt.s32.totalorder %s1007_s18, %s1007_s18 }
  0x1c   :  { %p888_p11 = scmp.ne.s32.totalorder %s1007_s18, %s887_s12  ;;  %p893_p13 = scmp.lt.s32.totalorder %s887_s12, %s887_s12 }
  0x1e   :  { %p894_p0 = por %p893_p13, %p892_p12 }
  0x20   :  { %p895_p1 = pnand %p894_p0, %p888_p11 }
  0x22   :  { %898 = shalt.err (!%p895_p1)
}
  0x23   :  { %25 = dma.hbm_to_vmem [thread:$0]  %s1086_s0, 2048, %s1007_s18, [#allocation3], %s975_s27, %s975_s27, %s976_s28  }
  0x24   :  { %s977_s14 = smov [#allocation7]   ;;  %s899_s19 = scalar_lea.hbm %s1088_s2, 2048 }
  0x25   :  { %s43_s15 = sshll.u32 %s977_s14, 4  ;;  %p900_p2 = scmp.ne.s32.totalorder %s1088_s2, %s899_s19  ;;  %s44_s15 = int_to_ptr.vmem [resolvable:$true] %s43_s15 }
  0x26   :  { %p903_p3 = scmp.lt.u32.totalorder %s899_s19, %s1088_s2 }
  0x28   :  { %p905_p4 = pnand %p903_p3, %p900_p2 }
  0x2a   :  { %908 = shalt.err (!%p905_p4)
}
  0x2b   :  { %s909_s24 = scalar_lea.vmem %s44_s15, 2048  ;;  %p914_p6 = scmp.lt.s32.totalorder %s44_s15, %s44_s15 }
  0x2c   :  { %p910_p5 = scmp.ne.s32.totalorder %s44_s15, %s909_s24  ;;  %p915_p7 = scmp.lt.s32.totalorder %s909_s24, %s909_s24 }
  0x2e   :  { %p916_p8 = por %p915_p7, %p914_p6 }
  0x30   :  { %p917_p9 = pnand %p916_p8, %p910_p5 }
  0x32   :  { %920 = shalt.err (!%p917_p9)
}
  0x33   :  { %49 = dma.hbm_to_vmem [thread:$0]  %s1088_s2, 2048, %s44_s15, [#allocation6], %s975_s27, %s975_s27, %s976_s28  }
  0x34   :  { %965 = dma.done.wait [#allocation3], 2048  }
  0x35   :  { %966 = vsyncadd [#allocation3], 4294965248 }
  0x36   :  { %967 = dma.done.wait [#allocation6], 4096  }
  0x37   :  { %968 = vsyncadd [#allocation6], 4294963200  ;;  %v75_v0 = vld [vmem:[#allocation5] sm:$0xff]  ;;  %v76_v1 = vld [vmem:[#allocation5 + $0x8] sm:$0xff]  ;;  %s978_s2 = smov [#allocation8]  }
  0x38   :  { %v77_v2 = vld [vmem:[#allocation5 + $0x10] sm:$0xff]  ;;  %v782_v3 = vpack.c.bf16 %v76_v1, %v75_v0  ;;  %v78_v4 = vld [vmem:[#allocation5 + $0x18] sm:$0xff]  ;;  %v79_v6 = vld [vmem:[#allocation5 + $0x20] sm:$0xff]  ;;  %s498_s25 = sshll.u32 %s978_s2, 4  ;;  %s499_s25 = int_to_ptr.vmem [resolvable:$true] %s498_s25 }
  0x39   :  { %v786_v5 = vpack.c.bf16 %v78_v4, %v77_v2  ;;  %v80_v7 = vld [vmem:[#allocation5 + $0x28] sm:$0xff]  ;;  %v59_v9 = vld [vmem:[#allocation2] sm:$0xff]  ;;  %v81_v10 = vld [vmem:[#allocation5 + $0x30] sm:$0xff]  ;;  %s921_s26 = scalar_lea.vmem %s499_s25, 1024  ;;  %p926_p11 = scmp.lt.s32.totalorder %s499_s25, %s499_s25 }
  0x3a   :  { %783 = vmatprep.subr.bf16.mxu0 %v782_v3  ;;  %v790_v8 = vpack.c.bf16 %v80_v7, %v79_v6  ;;  %v82_v11 = vld [vmem:[#allocation5 + $0x38] sm:$0xff]  ;;  %702 = vmatprep.mubr.f32.mxu0 %v59_v9  ;;  %v83_v13 = vld [vmem:[#allocation5 + $0x40] sm:$0xff]  ;;  %v84_v14 = vld [vmem:[#allocation5 + $0x48] sm:$0xff]  ;;  %p922_p10 = scmp.ne.s32.totalorder %s499_s25, %s921_s26  ;;  %p927_p12 = scmp.lt.s32.totalorder %s921_s26, %s921_s26 }
  0x3b   :  { %785 = vmatpush3.bf16.msra.mxu0 %v782_v3  ;;  %v794_v12 = vpack.c.bf16 %v82_v11, %v81_v10  ;;  %v236_v15 = vld [vmem:[#allocation7] sm:$0xff]  ;;  %v237_v16 = vld [vmem:[#allocation7 + $0x8] sm:$0xff]  ;;  %v238_v17 = vld [vmem:[#allocation7 + $0x10] sm:$0xff]  ;;  %v798_v21 = vpack.c.bf16 %v84_v14, %v83_v13 }
  0x3c   :  { %787 = vmatprep.subr.bf16.mxu0 %v786_v5  ;;  %v239_v18 = vld [vmem:[#allocation7 + $0x18] sm:$0xff]  ;;  %v814_v19 = vpack.c.bf16 %v237_v16, %v236_v15  ;;  %v240_v22 = vld [vmem:[#allocation7 + $0x20] sm:$0xff]  ;;  %v241_v23 = vld [vmem:[#allocation7 + $0x28] sm:$0xff]  ;;  %p928_p13 = por %p927_p12, %p926_p11 }
  0x3d   :  { %v818_v20 = vpack.c.bf16 %v239_v18, %v238_v17  ;;  %v85_v24 = vld [vmem:[#allocation5 + $0x50] sm:$0xff]  ;;  %v86_v25 = vld [vmem:[#allocation5 + $0x58] sm:$0xff]  ;;  %v822_v26 = vpack.c.bf16 %v241_v23, %v240_v22  ;;  %v87_v30 = vld [vmem:[#allocation5 + $0x60] sm:$0xff] }
  0x3e   :  { %815 = vmatprep.subr.bf16.mxu1 %v814_v19  ;;  %v802_v27 = vpack.c.bf16 %v86_v25, %v85_v24  ;;  %v242_v28 = vld [vmem:[#allocation7 + $0x30] sm:$0xff]  ;;  %v243_v29 = vld [vmem:[#allocation7 + $0x38] sm:$0xff]  ;;  %v88_v31 = vld [vmem:[#allocation5 + $0x68] sm:$0xff]  ;;  %p929_p0 = pnand %p928_p13, %p922_p10 }
  0x3f   :  { %789 = vmatpush3.bf16.msra.mxu0 %v786_v5  ;;  %817 = vmatpush3.bf16.msra.mxu1 %v814_v19  ;;  %v826_v32 = vpack.c.bf16 %v243_v29, %v242_v28  ;;  %v806_v33 = vpack.c.bf16 %v88_v31, %v87_v30  ;;  %v244_v34 = vld [vmem:[#allocation7 + $0x40] sm:$0xff]  ;;  %v245_v35 = vld [vmem:[#allocation7 + $0x48] sm:$0xff]  ;;  %v89_v36 = vld [vmem:[#allocation5 + $0x70] sm:$0xff] }
  0x40   :  { %791 = vmatprep.subr.bf16.mxu0 %v790_v8  ;;  %819 = vmatprep.subr.bf16.mxu1 %v818_v20  ;;  %v90_v37 = vld [vmem:[#allocation5 + $0x78] sm:$0xff]  ;;  %v830_v38 = vpack.c.bf16 %v245_v35, %v244_v34  ;;  %v246_v40 = vld [vmem:[#allocation7 + $0x50] sm:$0xff]  ;;  %v248_v43 = vld [vmem:[#allocation7 + $0x60] sm:$0xff] }
  0x41   :  { %v810_v39 = vpack.c.bf16 %v90_v37, %v89_v36  ;;  %v247_v41 = vld [vmem:[#allocation7 + $0x58] sm:$0xff]  ;;  %v249_v44 = vld [vmem:[#allocation7 + $0x68] sm:$0xff]  ;;  %v61_v47 = vld [vmem:[#allocation2 + $0x10] sm:$0xff] }
  0x42   :  { %v834_v42 = vpack.c.bf16 %v247_v41, %v246_v40  ;;  %v60_v45 = vld [vmem:[#allocation2 + $0x8] sm:$0xff]  ;;  %v838_v46 = vpack.c.bf16 %v249_v44, %v248_v43  ;;  %v250_v48 = vld [vmem:[#allocation7 + $0x70] sm:$0xff]  ;;  %v251_v49 = vld [vmem:[#allocation7 + $0x78] sm:$0xff] }
  0x43   :  { %793 = vmatpush3.bf16.msra.mxu0 %v790_v8  ;;  %821 = vmatpush3.bf16.msra.mxu1 %v818_v20  ;;  %v62_v50 = vld [vmem:[#allocation2 + $0x18] sm:$0xff]  ;;  %v842_v51 = vpack.c.bf16 %v251_v49, %v250_v48  ;;  %v63_v52 = vld [vmem:[#allocation2 + $0x20] sm:$0xff]  ;;  %v64_v53 = vld [vmem:[#allocation2 + $0x28] sm:$0xff] }
  0x44   :  { %795 = vmatprep.subr.bf16.mxu0 %v794_v12  ;;  %823 = vmatprep.subr.bf16.mxu1 %v822_v26  ;;  %v65_v54 = vld [vmem:[#allocation2 + $0x30] sm:$0xff]  ;;  %v66_v55 = vld [vmem:[#allocation2 + $0x38] sm:$0xff]  ;;  %v67_v56 = vld [vmem:[#allocation2 + $0x40] sm:$0xff] }
  0x45   :  { %v68_v57 = vld [vmem:[#allocation2 + $0x48] sm:$0xff]  ;;  %v69_v58 = vld [vmem:[#allocation2 + $0x50] sm:$0xff]  ;;  %v70_v59 = vld [vmem:[#allocation2 + $0x58] sm:$0xff] }
  0x46   :  { %v71_v60 = vld [vmem:[#allocation2 + $0x60] sm:$0xff]  ;;  %v72_v61 = vld [vmem:[#allocation2 + $0x68] sm:$0xff]  ;;  %v73_v62 = vld [vmem:[#allocation2 + $0x70] sm:$0xff] }
  0x47   :  { %797 = vmatpush3.bf16.msra.mxu0 %v794_v12  ;;  %825 = vmatpush3.bf16.msra.mxu1 %v822_v26  ;;  %v74_v63 = vld [vmem:[#allocation2 + $0x78] sm:$0xff] }
  0x48   :  { %799 = vmatprep.subr.bf16.mxu0 %v798_v21  ;;  %827 = vmatprep.subr.bf16.mxu1 %v826_v32 }
  0x4b   :  { %801 = vmatpush3.bf16.msra.mxu0 %v798_v21  ;;  %829 = vmatpush3.bf16.msra.mxu1 %v826_v32 }
  0x4c   :  { %803 = vmatprep.subr.bf16.mxu0 %v802_v27  ;;  %831 = vmatprep.subr.bf16.mxu1 %v830_v38 }
  0x4f   :  { %805 = vmatpush3.bf16.msra.mxu0 %v802_v27  ;;  %833 = vmatpush3.bf16.msra.mxu1 %v830_v38 }
  0x50   :  { %807 = vmatprep.subr.bf16.mxu0 %v806_v33  ;;  %835 = vmatprep.subr.bf16.mxu1 %v834_v42 }
  0x53   :  { %809 = vmatpush3.bf16.msra.mxu0 %v806_v33  ;;  %837 = vmatpush3.bf16.msra.mxu1 %v834_v42 }
  0x54   :  { %811 = vmatprep.subr.bf16.mxu0 %v810_v39  ;;  %839 = vmatprep.subr.bf16.mxu1 %v838_v46 }
  0x57   :  { %813 = vmatpush3.bf16.msra.mxu0 %v810_v39  ;;  %841 = vmatpush3.bf16.msra.mxu1 %v838_v46 }
  0x58   :  { %843 = vmatprep.subr.bf16.mxu1 %v842_v51 }
  0x5a   :  { %703 = vmatmul.mubr.f32.vlgmr.msra.gmra.mrb[0].mxu0 %v60_v45 }
  0x5b   :  { %705 = vmatprep.mubr.f32.mxu0 %v61_v47  ;;  %845 = vmatpush3.bf16.msra.mxu1 %v842_v51 }
  0x5e   :  { %706 = vmatmul.mubr.f32.gmra.mrb[2].mxu0 %v62_v50 }
  0x5f   :  { %708 = vmatprep.mubr.f32.mxu0 %v63_v52 }
  0x62   :  { %709 = vmatmul.mubr.f32.gmra.mrb[4].mxu0 %v64_v53 }
  0x63   :  { %711 = vmatprep.mubr.f32.mxu0 %v65_v54 }
  0x66   :  { %712 = vmatmul.mubr.f32.gmra.mrb[6].mxu0 %v66_v55 }
  0x67   :  { %714 = vmatprep.mubr.f32.mxu0 %v67_v56 }
  0x6a   :  { %715 = vmatmul.mubr.f32.gmra.mrb[8].mxu0 %v68_v57 }
  0x6b   :  { %717 = vmatprep.mubr.f32.mxu0 %v69_v58 }
  0x6e   :  { %718 = vmatmul.mubr.f32.gmra.mrb[10].mxu0 %v70_v59 }
  0x6f   :  { %720 = vmatprep.mubr.f32.mxu0 %v71_v60 }
  0x72   :  { %721 = vmatmul.mubr.f32.gmra.mrb[12].mxu0 %v72_v61 }
  0x73   :  { %723 = vmatprep.mubr.f32.mxu0 %v73_v62 }
  0x76   :  { %724 = vmatmul.mubr.f32.gmra.mrb[14].mxu0 %v74_v63 }
 0x12d   :  { %v704_v0 = vpop.f32.mrb[0].mxu0 }
 0x12e   :  { %v157_v1 = vpop.f32.mrb[1].mxu0 }
 0x12f   :  { %v562_v2 = vpack.c.bf16 %v704_v0, %v157_v1  ;;  %758 = vmatprep.mubr.f32.mxu1 %v157_v1 }
 0x130   :  { %759 = vmatmul.mubr.f32.vlgmr.msra.gmra.mrb[0].mxu1 %v704_v0 }
 0x131   :  { %563 = vst [vmem:[#allocation8] sm:$0xff] %v562_v2   ;;  %v707_v3 = vpop.f32.mrb[2].mxu0 }
 0x132   :  { %v167_v4 = vpop.f32.mrb[3].mxu0 }
 0x133   :  { %v567_v5 = vpack.c.bf16 %v707_v3, %v167_v4  ;;  %761 = vmatprep.mubr.f32.mxu1 %v167_v4 }
 0x134   :  { %762 = vmatmul.mubr.f32.gmra.mrb[2].mxu1 %v707_v3 }
 0x135   :  { %599 = vst [vmem:[#allocation8 + $0x8] sm:$0xff] %v567_v5   ;;  %v710_v6 = vpop.f32.mrb[4].mxu0 }
 0x136   :  { %v177_v7 = vpop.f32.mrb[5].mxu0 }
 0x137   :  { %v572_v8 = vpack.c.bf16 %v710_v6, %v177_v7  ;;  %764 = vmatprep.mubr.f32.mxu1 %v177_v7 }
 0x138   :  { %765 = vmatmul.mubr.f32.gmra.mrb[4].mxu1 %v710_v6 }
 0x139   :  { %600 = vst [vmem:[#allocation8 + $0x10] sm:$0xff] %v572_v8   ;;  %v713_v9 = vpop.f32.mrb[6].mxu0 }
 0x13a   :  { %v187_v10 = vpop.f32.mrb[7].mxu0 }
 0x13b   :  { %v577_v11 = vpack.c.bf16 %v713_v9, %v187_v10  ;;  %767 = vmatprep.mubr.f32.mxu1 %v187_v10 }
 0x13c   :  { %768 = vmatmul.mubr.f32.gmra.mrb[6].mxu1 %v713_v9 }
 0x13d   :  { %601 = vst [vmem:[#allocation8 + $0x18] sm:$0xff] %v577_v11   ;;  %v716_v12 = vpop.f32.mrb[8].mxu0 }
 0x13e   :  { %v197_v13 = vpop.f32.mrb[9].mxu0 }
 0x13f   :  { %v582_v14 = vpack.c.bf16 %v716_v12, %v197_v13  ;;  %770 = vmatprep.mubr.f32.mxu1 %v197_v13 }
 0x140   :  { %771 = vmatmul.mubr.f32.gmra.mrb[8].mxu1 %v716_v12 }
 0x141   :  { %602 = vst [vmem:[#allocation8 + $0x20] sm:$0xff] %v582_v14   ;;  %v719_v15 = vpop.f32.mrb[10].mxu0 }
 0x142   :  { %v207_v16 = vpop.f32.mrb[11].mxu0 }
 0x143   :  { %v587_v17 = vpack.c.bf16 %v719_v15, %v207_v16  ;;  %773 = vmatprep.mubr.f32.mxu1 %v207_v16 }
 0x144   :  { %774 = vmatmul.mubr.f32.gmra.mrb[10].mxu1 %v719_v15 }
 0x145   :  { %603 = vst [vmem:[#allocation8 + $0x28] sm:$0xff] %v587_v17   ;;  %v722_v18 = vpop.f32.mrb[12].mxu0 }
 0x146   :  { %v217_v19 = vpop.f32.mrb[13].mxu0 }
 0x147   :  { %v592_v20 = vpack.c.bf16 %v722_v18, %v217_v19  ;;  %776 = vmatprep.mubr.f32.mxu1 %v217_v19 }
 0x148   :  { %777 = vmatmul.mubr.f32.gmra.mrb[12].mxu1 %v722_v18 }
 0x149   :  { %604 = vst [vmem:[#allocation8 + $0x30] sm:$0xff] %v592_v20   ;;  %v725_v21 = vpop.f32.mrb[14].mxu0 }
 0x14a   :  { %v227_v22 = vpop.f32.mrb[15].mxu0 }
 0x14b   :  { %v597_v23 = vpack.c.bf16 %v725_v21, %v227_v22  ;;  %779 = vmatprep.mubr.f32.mxu1 %v227_v22 }
 0x14c   :  { %780 = vmatmul.mubr.f32.gmra.mrb[14].mxu1 %v725_v21 }
 0x14d   :  { %605 = vst [vmem:[#allocation8 + $0x38] sm:$0xff] %v597_v23  }
 0x14e   :  { %932 = shalt.err (!%p929_p0)
}
 0x14f   :  { %s933_s5 = scalar_lea.hbm %s1089_s3, 1024 }
 0x150   :  { %p934_p1 = scmp.ne.s32.totalorder %s1089_s3, %s933_s5  ;;  %p937_p2 = scmp.lt.u32.totalorder %s933_s5, %s1089_s3 }
 0x152   :  { %p939_p3 = pnand %p937_p2, %p934_p1 }
 0x154   :  { %942 = shalt.err (!%p939_p3)
}
 0x155   :  { %s979_s10 = smov 64   ;;  %s980_s11 = smov 4  }
 0x156   :  { %504 = dma.vmem_to_hbm [thread:$0]  %s499_s25, 1024, %s1089_s3, [#allocation4], %s979_s10, %s979_s10, %s980_s11  }
 0x157   :  { %s981_s3 = smov [#allocation9]  }
 0x158   :  { %s510_s13 = sshll.u32 %s981_s3, 4  ;;  %s511_s13 = int_to_ptr.vmem [resolvable:$true] %s510_s13 }
 0x159   :  { %s943_s14 = scalar_lea.vmem %s511_s13, 2048  ;;  %p948_p5 = scmp.lt.s32.totalorder %s511_s13, %s511_s13 }
 0x15a   :  { %p944_p4 = scmp.ne.s32.totalorder %s511_s13, %s943_s14  ;;  %p949_p6 = scmp.lt.s32.totalorder %s943_s14, %s943_s14 }
 0x15c   :  { %p950_p7 = por %p949_p6, %p948_p5 }
 0x15e   :  { %p951_p8 = pnand %p950_p7, %p944_p4 }
 0x203   :  { %v760_v24 = vpop.f32.mrb[0].mxu1 }
 0x204   :  { %398 = vst [vmem:[#allocation9 + $0x8] sm:$0xff] %v760_v24  ;;  %v318_v25 = vpop.f32.mrb[1].mxu1 }
 0x205   :  { %397 = vst [vmem:[#allocation9] sm:$0xff] %v318_v25 }
 0x207   :  { %v763_v26 = vpop.f32.mrb[2].mxu1 }
 0x208   :  { %400 = vst [vmem:[#allocation9 + $0x18] sm:$0xff] %v763_v26  ;;  %v328_v27 = vpop.f32.mrb[3].mxu1 }
 0x209   :  { %399 = vst [vmem:[#allocation9 + $0x10] sm:$0xff] %v328_v27 }
 0x20b   :  { %v766_v28 = vpop.f32.mrb[4].mxu1 }
 0x20c   :  { %402 = vst [vmem:[#allocation9 + $0x28] sm:$0xff] %v766_v28  ;;  %v338_v29 = vpop.f32.mrb[5].mxu1 }
 0x20d   :  { %401 = vst [vmem:[#allocation9 + $0x20] sm:$0xff] %v338_v29 }
 0x20f   :  { %v769_v30 = vpop.f32.mrb[6].mxu1 }
 0x210   :  { %404 = vst [vmem:[#allocation9 + $0x38] sm:$0xff] %v769_v30  ;;  %v348_v31 = vpop.f32.mrb[7].mxu1 }
 0x211   :  { %403 = vst [vmem:[#allocation9 + $0x30] sm:$0xff] %v348_v31 }
 0x213   :  { %v772_v32 = vpop.f32.mrb[8].mxu1 }
 0x214   :  { %406 = vst [vmem:[#allocation9 + $0x48] sm:$0xff] %v772_v32  ;;  %v358_v33 = vpop.f32.mrb[9].mxu1 }
 0x215   :  { %405 = vst [vmem:[#allocation9 + $0x40] sm:$0xff] %v358_v33 }
 0x217   :  { %v775_v34 = vpop.f32.mrb[10].mxu1 }
 0x218   :  { %408 = vst [vmem:[#allocation9 + $0x58] sm:$0xff] %v775_v34  ;;  %v368_v35 = vpop.f32.mrb[11].mxu1 }
 0x219   :  { %407 = vst [vmem:[#allocation9 + $0x50] sm:$0xff] %v368_v35 }
 0x21b   :  { %v778_v36 = vpop.f32.mrb[12].mxu1 }
 0x21c   :  { %410 = vst [vmem:[#allocation9 + $0x68] sm:$0xff] %v778_v36  ;;  %v378_v37 = vpop.f32.mrb[13].mxu1 }
 0x21d   :  { %409 = vst [vmem:[#allocation9 + $0x60] sm:$0xff] %v378_v37 }
 0x21f   :  { %v781_v38 = vpop.f32.mrb[14].mxu1 }
 0x220   :  { %412 = vst [vmem:[#allocation9 + $0x78] sm:$0xff] %v781_v38  ;;  %v388_v39 = vpop.f32.mrb[15].mxu1 }
 0x221   :  { %411 = vst [vmem:[#allocation9 + $0x70] sm:$0xff] %v388_v39 }
 0x222   :  { %954 = shalt.err (!%p951_p8)
}
 0x223   :  { %s955_s17 = scalar_lea.hbm %s1090_s4, 2048 }
 0x224   :  { %p956_p9 = scmp.ne.s32.totalorder %s1090_s4, %s955_s17  ;;  %p959_p10 = scmp.lt.u32.totalorder %s955_s17, %s1090_s4 }
 0x226   :  { %p961_p11 = pnand %p959_p10, %p956_p9 }
 0x228   :  { %964 = shalt.err (!%p961_p11)
}
 0x229   :  { %516 = dma.vmem_to_hbm [thread:$0]  %s511_s13, 2048, %s1090_s4, [#allocation10], %s975_s27, %s975_s27, %s976_s28  }
 0x22a   :  { %969 = dma.done.wait [#allocation4], 1024  }
 0x22b   :  { %970 = vsyncadd [#allocation4], 4294966272 }
 0x22c   :  { %971 = dma.done.wait [#allocation10], 2048  }
 0x22d   :  { %972 = vsyncadd [#allocation10], 4294965248 }
 0x22e   :  { %523 = vsyncpa [#allocation3], 1 }
 0x22f   :  { %524 = vsyncpa [#allocation6], 1 }
 0x230   :  { %525 = vsyncpa [#allocation4], 1 }
 0x231   :  { %526 = vsyncpa [#allocation10], 1 }

</bundles_post_ra>
